<compile_context>
chip_gen: v5e
topology: v5e:2x2
jax: 0.10.0
libtpu: 0.0.40
codegen_flags: <defaults>
</compile_context>

<pallas_src>
import jax
import jax.numpy as jnp
import numpy as np
from jax.experimental import pallas as pl
from jax.experimental.pallas import tpu as pltpu

TARGET_BLOCK_ELEMS = 1 << 20   # ~1M elems/block: 1 MiB u8 in + 4 MiB f32 out, x2 double-buffered


def gamma_kernel(x_ref, o_ref):
    """Elementwise gamma correction + uint8 truncation + ToTensor rescale to [0, 1]."""
    # uint8 -> int32 -> float32 inside the kernel; HBM reads stay at 1 byte/elem.
    x = x_ref[...].astype(jnp.int32).astype(jnp.float32)     # pixel values in [0, 255]
    norm = x * (1.0 / 255.0)                                  # img / 255.0
    powed = norm * norm * jnp.sqrt(norm)                      # norm ** 2.5 (EUP sqrt; sqrt(0) == 0)
    # np.uint8 cast truncates toward zero; values are non-negative so floor() is identical.
    g = jnp.floor(powed * 255.0)
    o_ref[...] = g * (1.0 / 255.0)                            # ToTensor's /255 rescale


def _pick_tile_rows(rows, width):
    """Row-tile size: full array if it already fits a block, else a multiple of 32."""
    if rows * width <= TARGET_BLOCK_ELEMS:
        return rows                                  # single full block: tiling constraint waived
    t = max(32, (TARGET_BLOCK_ELEMS // width) // 32 * 32)
    return min(t, rows)


def _gamma_forward_impl(img_u8):
    """img_u8: (H, W, C) uint8 image (HWC, numpy/PIL convention).
    Returns: (C, H, W) float32 tensor in [0, 1] (ToTensor convention)."""
    H, W, C = img_u8.shape
    rows = C * H

    # ToTensor's HWC -> CHW permutation, done on the 1-byte input so the kernel writes the
    # final CHW f32 layout directly.  The (C,H,W) -> (C*H,W) reshape is free (row-major).
    x2d = jnp.transpose(img_u8, (2, 0, 1)).reshape(rows, W)

    tile_rows = _pick_tile_rows(rows, W)
    grid = (pl.cdiv(rows, tile_rows),)               # uneven last block handled by edge masking

    out2d = pl.pallas_call(
        gamma_kernel,
        out_shape=jax.ShapeDtypeStruct((rows, W), jnp.float32),
        grid=grid,
        in_specs=[pl.BlockSpec((tile_rows, W), lambda i: (i, 0))],
        out_specs=pl.BlockSpec((tile_rows, W), lambda i: (i, 0)),
        compiler_params=pltpu.CompilerParams(
            dimension_semantics=("parallel",),        # v7x: shard blocks across both TensorCores
        ),
    )(x2d)

    return out2d.reshape(C, H, W)                     # free reshape back to CHW


gamma_forward = jax.jit(_gamma_forward_impl)


if __name__ == "__main__":
    key = jax.random.PRNGKey(0)
    H, W, C = 16, 16, 3
    img_u8 = jax.random.randint(key, (H, W, C), 0, 256, dtype=jnp.int32).astype(jnp.uint8)

    out = jax.block_until_ready(gamma_forward(img_u8))

    # Reference check: exact PyTorch/numpy semantics computed in float64.
    img_np = np.asarray(img_u8).astype(np.float64)
    ref = (np.power(img_np / 255.0, 2.5) * 255.0).astype(np.uint8)    # HWC uint8
    ref = np.transpose(ref.astype(np.float32) / 255.0, (2, 0, 1))     # CHW float32 in [0, 1]

    assert out.shape == (C, H, W), out.shape
    assert out.dtype == jnp.float32
    # f32 pow vs float64 pow can differ by one uint8 level right at integer boundaries.
    np.testing.assert_allclose(np.asarray(out), ref, atol=1.0 / 255.0 + 1e-6)

    print("KERNEL_OK")
</pallas_src>

<mosaic_0001>
module attributes {stable_mosaic.version = 11 : i64} {
  func.func @gamma_kernel(%arg0: i32, %arg1: memref<48x16xi8, #tpu.memory_space<vmem>>, %arg2: memref<48x16xf32, #tpu.memory_space<vmem>>) attributes {dimension_semantics = [#tpu.dimension_semantics<parallel>], iteration_bounds = array<i64: 1>, scalar_prefetch = 0 : i64, scratch_operands = 0 : i64, tpu.core_type = #tpu.core_type<tc>, window_params = [{transform_indices = @transform_0, window_bounds = array<i64: 48, 16>}, {transform_indices = @transform_1, window_bounds = array<i64: 48, 16>}]} {
    %c0 = arith.constant 0 : index
    %c0_0 = arith.constant 0 : index
    %0 = vector.load %arg1[%c0, %c0_0] : memref<48x16xi8, #tpu.memory_space<vmem>>, vector<48x16xi8>
    %1 = arith.extui %0 : vector<48x16xi8> to vector<48x16xi32>
    %2 = arith.sitofp %1 : vector<48x16xi32> to vector<48x16xf32>
    %cst = arith.constant 0.00392156886 : f32
    %3 = vector.broadcast %cst : f32 to vector<48x16xf32>
    %4 = arith.mulf %2, %3 : vector<48x16xf32>
    %5 = arith.mulf %4, %4 : vector<48x16xf32>
    %6 = math.sqrt %4 : vector<48x16xf32>
    %7 = arith.mulf %5, %6 : vector<48x16xf32>
    %cst_1 = arith.constant 2.550000e+02 : f32
    %8 = vector.broadcast %cst_1 : f32 to vector<48x16xf32>
    %9 = arith.mulf %7, %8 : vector<48x16xf32>
    %10 = math.floor %9 : vector<48x16xf32>
    %cst_2 = arith.constant 0.00392156886 : f32
    %11 = vector.broadcast %cst_2 : f32 to vector<48x16xf32>
    %12 = arith.mulf %10, %11 : vector<48x16xf32>
    %c0_3 = arith.constant 0 : index
    %c0_4 = arith.constant 0 : index
    %13 = vector.load %arg2[%c0_3, %c0_4] : memref<48x16xf32, #tpu.memory_space<vmem>>, vector<48x16xf32>
    tpu.vector_store %arg2[%c0_3, %c0_4], %12 {strides = array<i32>} : memref<48x16xf32, #tpu.memory_space<vmem>>, vector<48x16xf32>,
    return
  }
  func.func @transform_0(%arg0: i32) -> (i32, i32) {
    %c0_i32 = arith.constant 0 : i32
    %c0_i32_0 = arith.constant 0 : i32
    return %arg0, %c0_i32 : i32, i32
  }
  func.func @transform_1(%arg0: i32) -> (i32, i32) {
    %c0_i32 = arith.constant 0 : i32
    %c0_i32_0 = arith.constant 0 : i32
    return %arg0, %c0_i32 : i32, i32
  }
}

</mosaic_0001>

<bundles_post_ra>
// kernel: _gamma_forward_impl.1
= control target key start
LH: loop header
LB: loop body
LE: loop exit
PB: predicated region body
PF: predicated region fallthrough
CT: control target
= control target key end

     0   :  { %6 = vsyncpa [#allocation3], 0  ;;  %s385_s0 = inlined_call_operand.hbm [shape: u8[48,16], index: 0, kind: input, shape index: {}]   ;;  %s386_s1 = inlined_call_operand.hbm [shape: f32[48,16], index: 1, kind: output, shape index: {}]  }
   0x1   :  { %7 = vsyncpa [#allocation4], 0  ;;  %s12_s8 = sshll.u32 %s385_s0, 4  ;;  %s267_s9 = smov [#allocation2]   ;;  %s13_s8 = int_to_ptr.hbm [resolvable:$true] %s12_s8 }
   0x2   :  { %s14_s10 = sshll.u32 %s267_s9, 4  ;;  %s268_s11 = smov 32   ;;  %s15_s10 = int_to_ptr.vmem [resolvable:$true] %s14_s10 }
   0x3   :  { %s269_s12 = smov 2  }
   0x4   :  { %20 = dma.hbm_to_vmem [thread:$0]  %s13_s8, 192, %s15_s10, [#allocation3], %s268_s11, %s268_s11, %s269_s12  }
   0x5   :  { %263 = dma.done.wait [#allocation3], 192  }
   0x6   :  { %264 = vsyncadd [#allocation3], 4294967104  ;;  %v184_v0 = vld [vmem:[#allocation2] sm:$0xff]   ;;  %v196_v1 = vld [vmem:[#allocation2 + $0x8] sm:$0xf]   ;;  %vm157_vm12 = vcmask 130048  }
   0x7   :  { %v185_v2 = vunpack.c.0.s8 %v184_v0  ;;  %v186_v3 = vunpack.c.1.s8 %v184_v0  ;;  %v189_v4 = vunpack.c.2.s8 %v184_v0  ;;  %v190_v5 = vunpack.c.3.s8 %v184_v0  ;;  %s270_s0 = smov [#allocation5]   ;;  %s170_s16 = sshll.u32 %s386_s1, 4  ;;  %s171_s16 = int_to_ptr.hbm [resolvable:$true] %s170_s16 }
   0x8   :  { %v193_v6 = vunpack.c.0.s8 %v196_v1  ;;  %v194_v7 = vunpack.c.1.s8 %v196_v1  ;;  %s168_s13 = sshll.u32 %s270_s0, 4  ;;  %s271_s17 = smov 128   ;;  %s169_s13 = int_to_ptr.vmem [resolvable:$true] %s168_s13 }
   0x9   :  { %v37_v8 = vand.u32 255, %v185_v2  ;;  %v38_v9 = vand.u32 255, %v186_v3  ;;  %v39_v10 = vand.u32 255, %v189_v4  ;;  %v40_v11 = vand.u32 255, %v190_v5  ;;  %s272_s18 = smov 8  }
   0xa   :  { %v41_v12 = vand.u32 255, %v193_v6  ;;  %v42_v13 = vand.u32 255, %v194_v7 }
   0xb   :  { %v43_v14 = vcvt.s32.f32 %v37_v8  ;;  %v44_v15 = vcvt.s32.f32 %v38_v9  ;;  %v45_v16 = vcvt.s32.f32 %v39_v10  ;;  %v46_v17 = vcvt.s32.f32 %v40_v11 }
   0xc   :  { %v47_v18 = vcvt.s32.f32 %v41_v12  ;;  %v48_v22 = vcvt.s32.f32 %v42_v13 }
   0xd   :  { %v286_v19 = vmul.f32 0.003921569, %v43_v14  ;;  %v288_v20 = vmul.f32 0.003921569, %v44_v15  ;;  %v290_v21 = vmul.f32 0.003921569, %v45_v16 }
   0xe   :  { %v293_v23 = vmul.f32 0.003921569, %v46_v17  ;;  %v296_v24 = vmul.f32 0.003921569, %v47_v18  ;;  %v299_v25 = vmul.f32 0.003921569, %v48_v22 }
   0xf   :  { %203 = vrsqrt.f32 %v286_v19  ;;  %v55_v28 = vmul.f32 %v286_v19, %v286_v19  ;;  %vm68_vm0 = vcmp.eq.f32.partialorder %v286_v19, inf  ;;  %v71_v31 = vand.u32 2147483648, %v286_v19 }
  0x10   :  { %205 = vrsqrt.f32 %v288_v20  ;;  %v56_v32 = vmul.f32 %v288_v20, %v288_v20  ;;  %vm70_vm1 = vcmp.eq.f32.partialorder %v286_v19, 0.0  ;;  %vm80_vm2 = vcmp.eq.f32.partialorder %v288_v20, inf }
  0x11   :  { %207 = vrsqrt.f32 %v290_v21  ;;  %v83_v35 = vand.u32 2147483648, %v288_v20  ;;  %vm82_vm3 = vcmp.eq.f32.partialorder %v288_v20, 0.0  ;;  %v57_v39 = vmul.f32 %v290_v21, %v290_v21 }
  0x12   :  { %209 = vrsqrt.f32 %v293_v23  ;;  %vm92_vm4 = vcmp.eq.f32.partialorder %v290_v21, inf  ;;  %v95_v40 = vand.u32 2147483648, %v290_v21  ;;  %vm94_vm5 = vcmp.eq.f32.partialorder %v290_v21, 0.0 }
  0x13   :  { %211 = vrsqrt.f32 %v296_v24  ;;  %v58_v44 = vmul.f32 %v293_v23, %v293_v23  ;;  %vm104_vm6 = vcmp.eq.f32.partialorder %v293_v23, inf  ;;  %v107_v48 = vand.u32 2147483648, %v293_v23 }
  0x14   :  { %213 = vrsqrt.f32 %v299_v25  ;;  %vm106_vm7 = vcmp.eq.f32.partialorder %v293_v23, 0.0  ;;  %v59_v55 = vmul.f32 %v296_v24, %v296_v24  ;;  %vm116_vm8 = vcmp.eq.f32.partialorder %v296_v24, inf }
  0x15   :  { %v204_v26 = vpop.eup %203  ;;  %vm118_vm9 = vcmp.eq.f32.partialorder %v296_v24, 0.0  ;;  %v119_v63 = vand.u32 2147483648, %v296_v24  ;;  %v60_v6 = vmul.f32 %v299_v25, %v299_v25  ;;  %vm128_vm10 = vcmp.eq.f32.partialorder %v299_v25, inf }
  0x16   :  { %v206_v27 = vpop.eup %205  ;;  %v62_v29 = vmul.f32 %v204_v26, %v286_v19  ;;  %vm130_vm11 = vcmp.eq.f32.partialorder %v299_v25, 0.0 }
  0x17   :  { %v208_v30 = vpop.eup %207  ;;  %v74_v33 = vmul.f32 %v206_v27, %v288_v20 }
  0x18   :  { %v63_v34 = vmul.f32 %v204_v26, %v62_v29  ;;  %v86_v36 = vmul.f32 %v208_v30, %v290_v21  ;;  %v210_v37 = vpop.eup %209 }
  0x19   :  { %v75_v38 = vmul.f32 %v206_v27, %v74_v33  ;;  %v212_v41 = vpop.eup %211  ;;  %v98_v45 = vmul.f32 %v210_v37, %v293_v23 }
  0x1a   :  { %v64_v42 = vmul.f32 0.5, %v63_v34  ;;  %v87_v43 = vmul.f32 %v208_v30, %v86_v36  ;;  %v214_v46 = vpop.eup %213  ;;  %v110_v49 = vmul.f32 %v212_v41, %v296_v24 }
  0x1b   :  { %v76_v47 = vmul.f32 0.5, %v75_v38  ;;  %v99_v52 = vmul.f32 %v210_v37, %v98_v45  ;;  %v122_v53 = vmul.f32 %v214_v46, %v299_v25 }
  0x1c   :  { %v65_v50 = vsub.f32 1.5, %v64_v42  ;;  %v88_v51 = vmul.f32 0.5, %v87_v43  ;;  %v111_v56 = vmul.f32 %v212_v41, %v110_v49 }
  0x1d   :  { %v77_v54 = vsub.f32 1.5, %v76_v47  ;;  %v100_v59 = vmul.f32 0.5, %v99_v52  ;;  %v123_v60 = vmul.f32 %v214_v46, %v122_v53 }
  0x1e   :  { %v66_v57 = vmul.f32 %v204_v26, %v65_v50  ;;  %v89_v58 = vsub.f32 1.5, %v88_v51  ;;  %v112_v62 = vmul.f32 0.5, %v111_v56 }
  0x1f   :  { %v78_v61 = vmul.f32 %v206_v27, %v77_v54  ;;  %v101_v2 = vsub.f32 1.5, %v100_v59  ;;  %v124_v3 = vmul.f32 0.5, %v123_v60 }
  0x20   :  { %v67_v0 = vmul.f32 %v66_v57, %v286_v19  ;;  %v90_v1 = vmul.f32 %v208_v30, %v89_v58  ;;  %v113_v5 = vsub.f32 1.5, %v112_v62 }
  0x21   :  { %v79_v4 = vmul.f32 %v78_v61, %v288_v20  ;;  %v102_v9 = vmul.f32 %v210_v37, %v101_v2  ;;  %v125_v10 = vsub.f32 1.5, %v124_v3 }
  0x22   :  { %v69_v7 = vsel %vm68_vm0, %v286_v19, %v67_v0  ;;  %v91_v8 = vmul.f32 %v90_v1, %v290_v21  ;;  %v114_v13 = vmul.f32 %v212_v41, %v113_v5 }
  0x23   :  { %v72_v11 = vsel %vm70_vm1, %v71_v31, %v69_v7  ;;  %v81_v12 = vsel %vm80_vm2, %v288_v20, %v79_v4  ;;  %v103_v17 = vmul.f32 %v102_v9, %v293_v23  ;;  %v126_v26 = vmul.f32 %v214_v46, %v125_v10 }
  0x24   :  { %v133_v14 = vmul.f32 %v72_v11, %v55_v28  ;;  %v84_v15 = vsel %vm82_vm3, %v83_v35, %v81_v12  ;;  %v93_v16 = vsel %vm92_vm4, %v290_v21, %v91_v8  ;;  %v115_v22 = vmul.f32 %v114_v13, %v296_v24 }
  0x25   :  { %v134_v18 = vmul.f32 %v84_v15, %v56_v32  ;;  %v96_v19 = vsel %vm94_vm5, %v95_v40, %v93_v16  ;;  %v105_v20 = vsel %vm104_vm6, %v293_v23, %v103_v17  ;;  %v131_v28 = vand.u32 2147483648, %v299_v25 }
  0x26   :  { %v139_v27 = vmul.f32 255.0, %v133_v14  ;;  %v135_v29 = vmul.f32 %v96_v19, %v57_v39  ;;  %v108_v31 = vsel %vm106_vm7, %v107_v48, %v105_v20  ;;  %v117_v21 = vsel %vm116_vm8, %v296_v24, %v115_v22 }
  0x27   :  { %v140_v30 = vmul.f32 255.0, %v134_v18  ;;  %v127_v32 = vmul.f32 %v126_v26, %v299_v25  ;;  %v136_v35 = vmul.f32 %v108_v31, %v58_v44  ;;  %v120_v36 = vsel %vm118_vm9, %v119_v63, %v117_v21 }
  0x28   :  { %v145_v33 = vfloor.f32 %v139_v27  ;;  %v141_v34 = vmul.f32 255.0, %v135_v29  ;;  %v137_v38 = vmul.f32 %v120_v36, %v59_v55 }
  0x29   :  { %v146_v37 = vfloor.f32 %v140_v30  ;;  %v129_v23 = vsel %vm128_vm10, %v299_v25, %v127_v32  ;;  %v142_v41 = vmul.f32 255.0, %v136_v35 }
  0x2a   :  { %v151_v39 = vmul.f32 0.003921569, %v145_v33  ;;  %v147_v40 = vfloor.f32 %v141_v34  ;;  %v132_v42 = vsel %vm130_vm11, %v131_v28, %v129_v23  ;;  %v143_v45 = vmul.f32 255.0, %v137_v38 }
  0x2b   :  { %v152_v43 = vmul.f32 0.003921569, %v146_v37  ;;  %v138_v46 = vmul.f32 %v132_v42, %v60_v6  ;;  %v148_v44 = vfloor.f32 %v142_v41 }
  0x2c   :  { %158 = vst.msk [vmem:[#allocation5] sm:$0xff] %vm157_vm12, %v151_v39  ;;  %v153_v24 = vmul.f32 0.003921569, %v147_v40  ;;  %v149_v47 = vfloor.f32 %v143_v45 }
  0x2d   :  { %159 = vst.msk [vmem:[#allocation5 + $0x8] sm:$0xff] %vm157_vm12, %v152_v43  ;;  %v144_v48 = vmul.f32 255.0, %v138_v46  ;;  %v154_v25 = vmul.f32 0.003921569, %v148_v44 }
  0x2e   :  { %160 = vst.msk [vmem:[#allocation5 + $0x10] sm:$0xff] %vm157_vm12, %v153_v24  ;;  %v155_v49 = vmul.f32 0.003921569, %v149_v47 }
  0x2f   :  { %v150_v50 = vfloor.f32 %v144_v48  ;;  %161 = vst.msk [vmem:[#allocation5 + $0x18] sm:$0xff] %vm157_vm12, %v154_v25 }
  0x30   :  { %162 = vst.msk [vmem:[#allocation5 + $0x20] sm:$0xff] %vm157_vm12, %v155_v49 }
  0x31   :  { %v156_v51 = vmul.f32 0.003921569, %v150_v50 }
  0x33   :  { %163 = vst.msk [vmem:[#allocation5 + $0x28] sm:$0xff] %vm157_vm12, %v156_v51 }
  0x34   :  { %176 = dma.vmem_to_hbm [thread:$0]  %s169_s13, 768, %s171_s16, [#allocation4], %s271_s17, %s271_s17, %s272_s18  }
  0x35   :  { %265 = dma.done.wait [#allocation4], 768  }
  0x36   :  { %266 = vsyncadd [#allocation4], 4294966528 }
  0x37   :  { %181 = vsyncpa [#allocation3], 1 }
  0x38   :  { %182 = vsyncpa [#allocation4], 1 }

</bundles_post_ra>
